<compile_context>
chip_gen: v6e
topology: v6e:2x2x1
jax: 0.10.0
libtpu: 0.0.40
codegen_flags: <defaults>
</compile_context>

<pallas_src>
import jax
import jax.numpy as jnp
from jax.experimental import pallas as pl
from jax.experimental.pallas import tpu as pltpu


def _round_up(n, m):
    return ((n + m - 1) // m) * m


def mlp_softmax_kernel(x_ref, w1_ref, b1_ref, w2_ref, b2_ref, o_ref):
    # fc1: (TB, Dp) @ (Dp, Hp) -> f32 accumulate, bias + ReLU in f32.
    h = jnp.dot(x_ref[...], w1_ref[...], preferred_element_type=jnp.float32)
    h = jnp.maximum(h + b1_ref[...], 0.0)
    # fc2: cast activations back to bf16 for the MXU, accumulate in f32.
    logits = jnp.dot(h.astype(w2_ref.dtype), w2_ref[...],
                     preferred_element_type=jnp.float32)
    logits = logits + b2_ref[...]  # padded columns carry -1e30 bias -> exp() == 0
    # Numerically stable softmax over the class (lane) dimension.
    m = jnp.max(logits, axis=1, keepdims=True)
    e = jnp.exp(logits - m)
    denom = jnp.sum(e, axis=1, keepdims=True)
    o_ref[...] = (e * pl.reciprocal(denom, approx=True)).astype(o_ref.dtype)


def protein_classifier_forward(x, w1, b1, w2, b2, *, block_b=256):
    """x: (B, input_dim) f32; w1: (input_dim, hidden); b1: (1, hidden);
    w2: (hidden, output_dim); b2: (1, output_dim).  Returns (B, output_dim) f32."""
    batch, input_dim = x.shape
    hidden_dim = w1.shape[1]
    output_dim = w2.shape[1]

    # Lane/sublane-friendly padded sizes.
    d_pad = _round_up(input_dim, 128)
    h_pad = _round_up(hidden_dim, 128)
    o_pad = _round_up(output_dim, 128)
    tb = min(block_b, _round_up(batch, 8))     # batch tile (256 cap, 8-row aligned)
    b_pad = _round_up(batch, tb)

    # Pad + cast MXU operands to bf16; biases stay f32.
    xp = jnp.zeros((b_pad, d_pad), jnp.bfloat16)
    xp = xp.at[:batch, :input_dim].set(x.astype(jnp.bfloat16))
    w1p = jnp.zeros((d_pad, h_pad), jnp.bfloat16)
    w1p = w1p.at[:input_dim, :hidden_dim].set(w1.astype(jnp.bfloat16))
    b1p = jnp.zeros((1, h_pad), jnp.float32)
    b1p = b1p.at[:, :hidden_dim].set(b1.astype(jnp.float32))
    w2p = jnp.zeros((h_pad, o_pad), jnp.bfloat16)
    w2p = w2p.at[:hidden_dim, :output_dim].set(w2.astype(jnp.bfloat16))
    # Padded logit columns get a huge negative bias so softmax ignores them exactly.
    b2p = jnp.full((1, o_pad), -1e30, jnp.float32)
    b2p = b2p.at[:, :output_dim].set(b2.astype(jnp.float32))

    grid = (b_pad // tb,)
    out_padded = pl.pallas_call(
        mlp_softmax_kernel,
        out_shape=jax.ShapeDtypeStruct((b_pad, o_pad), jnp.float32),
        grid=grid,
        in_specs=[
            pl.BlockSpec((tb, d_pad), lambda i: (i, 0)),     # x: streamed per batch tile
            pl.BlockSpec((d_pad, h_pad), lambda i: (0, 0)),  # w1: resident in VMEM
            pl.BlockSpec((1, h_pad), lambda i: (0, 0)),      # b1: resident
            pl.BlockSpec((h_pad, o_pad), lambda i: (0, 0)),  # w2: resident
            pl.BlockSpec((1, o_pad), lambda i: (0, 0)),      # b2: resident
        ],
        out_specs=pl.BlockSpec((tb, o_pad), lambda i: (i, 0)),
        compiler_params=pltpu.CompilerParams(
            dimension_semantics=("parallel",),   # megacore-shard the batch axis on v7x
            vmem_limit_bytes=32 * 1024 * 1024,
        ),
    )(xp, w1p, b1p, w2p, b2p)
    return out_padded[:batch, :output_dim]


def init_params(key, input_dim, hidden_dim, output_dim):
    # Deterministic init mimicking nn.Linear's uniform(-1/sqrt(fan_in), 1/sqrt(fan_in)).
    k1, k2, k3, k4 = jax.random.split(key, 4)
    lim1 = 1.0 / jnp.sqrt(jnp.float32(input_dim))
    lim2 = 1.0 / jnp.sqrt(jnp.float32(hidden_dim))
    w1 = jax.random.uniform(k1, (input_dim, hidden_dim), jnp.float32, -lim1, lim1)
    b1 = jax.random.uniform(k2, (1, hidden_dim), jnp.float32, -lim1, lim1)
    w2 = jax.random.uniform(k3, (hidden_dim, output_dim), jnp.float32, -lim2, lim2)
    b2 = jax.random.uniform(k4, (1, output_dim), jnp.float32, -lim2, lim2)
    return w1, b1, w2, b2


if __name__ == "__main__":
    input_dim, hidden_dim, output_dim = 32, 64, 16
    batch = 8

    key = jax.random.PRNGKey(0)
    kx, kp = jax.random.split(key)
    x = jax.random.normal(kx, (batch, input_dim), jnp.float32)
    w1, b1, w2, b2 = init_params(kp, input_dim, hidden_dim, output_dim)

    out = protein_classifier_forward(x, w1, b1, w2, b2)
    out = jax.block_until_ready(out)

    # Reference in plain f32 JAX (same math as the PyTorch module).
    h_ref = jnp.maximum(x @ w1 + b1, 0.0)
    logits_ref = h_ref @ w2 + b2
    ref = jax.nn.softmax(logits_ref, axis=1)

    assert out.shape == (batch, output_dim)
    # bf16 MXU inputs + approx reciprocal -> relaxed tolerance vs f32 reference.
    assert jnp.allclose(out, ref, atol=3e-2, rtol=3e-2)
    assert jnp.allclose(jnp.sum(out, axis=1), 1.0, atol=1e-2)
    assert jnp.all(out >= 0.0)

    print("KERNEL_OK")
</pallas_src>

<mosaic_0001>
module attributes {stable_mosaic.version = 11 : i64} {
  func.func @mlp_softmax_kernel(%arg0: i32, %arg1: memref<8x128xbf16, #tpu.memory_space<vmem>>, %arg2: memref<128x128xbf16, #tpu.memory_space<vmem>>, %arg3: memref<1x128xf32, #tpu.memory_space<vmem>>, %arg4: memref<128x128xbf16, #tpu.memory_space<vmem>>, %arg5: memref<1x128xf32, #tpu.memory_space<vmem>>, %arg6: memref<8x128xf32, #tpu.memory_space<vmem>>) attributes {dimension_semantics = [#tpu.dimension_semantics<parallel>], iteration_bounds = array<i64: 1>, scalar_prefetch = 0 : i64, scratch_operands = 0 : i64, tpu.core_type = #tpu.core_type<tc>, window_params = [{transform_indices = @transform_0, window_bounds = array<i64: 8, 128>}, {pipeline_mode = #tpu.pipeline_mode<synchronous>, transform_indices = @transform_1, window_bounds = array<i64: 128, 128>}, {pipeline_mode = #tpu.pipeline_mode<synchronous>, transform_indices = @transform_2, window_bounds = array<i64: 1, 128>}, {pipeline_mode = #tpu.pipeline_mode<synchronous>, transform_indices = @transform_3, window_bounds = array<i64: 128, 128>}, {pipeline_mode = #tpu.pipeline_mode<synchronous>, transform_indices = @transform_4, window_bounds = array<i64: 1, 128>}, {transform_indices = @transform_5, window_bounds = array<i64: 8, 128>}]} {
    %c0 = arith.constant 0 : index
    %c0_0 = arith.constant 0 : index
    %0 = vector.load %arg1[%c0, %c0_0] : memref<8x128xbf16, #tpu.memory_space<vmem>>, vector<8x128xbf16>
    %c0_1 = arith.constant 0 : index
    %c0_2 = arith.constant 0 : index
    %1 = vector.load %arg2[%c0_1, %c0_2] : memref<128x128xbf16, #tpu.memory_space<vmem>>, vector<128x128xbf16>
    %cst = arith.constant dense<0.000000e+00> : vector<8x128xf32>
    %2 = tpu.matmul %0, %1, %cst {dimension_numbers = #tpu.dot_dimension_numbers<[1], [0], [0], [1], [0, 0, 1, 1], [], []>} : vector<8x128xbf16>, vector<128x128xbf16>, vector<8x128xf32> -> vector<8x128xf32>
    %c0_3 = arith.constant 0 : index
    %c0_4 = arith.constant 0 : index
    %3 = vector.load %arg3[%c0_3, %c0_4] : memref<1x128xf32, #tpu.memory_space<vmem>>, vector<1x128xf32>
    %4 = vector.broadcast %3 : vector<1x128xf32> to vector<8x128xf32>
    %5 = arith.addf %2, %4 : vector<8x128xf32>
    %cst_5 = arith.constant 0.000000e+00 : f32
    %6 = vector.broadcast %cst_5 : f32 to vector<8x128xf32>
    %7 = arith.maximumf %5, %6 : vector<8x128xf32>
    %8 = arith.truncf %7 : vector<8x128xf32> to vector<8x128xbf16>
    %c0_6 = arith.constant 0 : index
    %c0_7 = arith.constant 0 : index
    %9 = vector.load %arg4[%c0_6, %c0_7] : memref<128x128xbf16, #tpu.memory_space<vmem>>, vector<128x128xbf16>
    %cst_8 = arith.constant dense<0.000000e+00> : vector<8x128xf32>
    %10 = tpu.matmul %8, %9, %cst_8 {dimension_numbers = #tpu.dot_dimension_numbers<[1], [0], [0], [1], [0, 0, 1, 1], [], []>} : vector<8x128xbf16>, vector<128x128xbf16>, vector<8x128xf32> -> vector<8x128xf32>
    %c0_9 = arith.constant 0 : index
    %c0_10 = arith.constant 0 : index
    %11 = vector.load %arg5[%c0_9, %c0_10] : memref<1x128xf32, #tpu.memory_space<vmem>>, vector<1x128xf32>
    %12 = vector.broadcast %11 : vector<1x128xf32> to vector<8x128xf32>
    %13 = arith.addf %10, %12 : vector<8x128xf32>
    %cst_11 = arith.constant dense<0xFF800000> : vector<8xf32>
    %14 = vector.multi_reduction <maximumf>, %13, %cst_11 [1] : vector<8x128xf32> to vector<8xf32>
    %15 = vector.shape_cast %14 : vector<8xf32> to vector<8x1xf32>
    %16 = vector.broadcast %15 : vector<8x1xf32> to vector<8x128xf32>
    %17 = arith.subf %13, %16 : vector<8x128xf32>
    %18 = math.exp %17 : vector<8x128xf32>
    %cst_12 = arith.constant dense<0.000000e+00> : vector<8xf32>
    %19 = vector.multi_reduction <add>, %18, %cst_12 [1] : vector<8x128xf32> to vector<8xf32>
    %20 = vector.shape_cast %19 : vector<8xf32> to vector<8x1xf32>
    %21 = tpu.reciprocal %20 {approx = true} : vector<8x1xf32> -> vector<8x1xf32>
    %22 = vector.broadcast %21 : vector<8x1xf32> to vector<8x128xf32>
    %23 = arith.mulf %18, %22 : vector<8x128xf32>
    %c0_13 = arith.constant 0 : index
    %c0_14 = arith.constant 0 : index
    %24 = vector.load %arg6[%c0_13, %c0_14] : memref<8x128xf32, #tpu.memory_space<vmem>>, vector<8x128xf32>
    tpu.vector_store %arg6[%c0_13, %c0_14], %23 {strides = array<i32>} : memref<8x128xf32, #tpu.memory_space<vmem>>, vector<8x128xf32>,
    return
  }
  func.func @transform_0(%arg0: i32) -> (i32, i32) {
    %c0_i32 = arith.constant 0 : i32
    %c0_i32_0 = arith.constant 0 : i32
    return %arg0, %c0_i32 : i32, i32
  }
  func.func @transform_1(%arg0: i32) -> (i32, i32) {
    %c0_i32 = arith.constant 0 : i32
    %c0_i32_0 = arith.constant 0 : i32
    %c0_i32_1 = arith.constant 0 : i32
    return %c0_i32, %c0_i32_0 : i32, i32
  }
  func.func @transform_2(%arg0: i32) -> (i32, i32) {
    %c0_i32 = arith.constant 0 : i32
    %c0_i32_0 = arith.constant 0 : i32
    %c0_i32_1 = arith.constant 0 : i32
    return %c0_i32, %c0_i32_0 : i32, i32
  }
  func.func @transform_3(%arg0: i32) -> (i32, i32) {
    %c0_i32 = arith.constant 0 : i32
    %c0_i32_0 = arith.constant 0 : i32
    %c0_i32_1 = arith.constant 0 : i32
    return %c0_i32, %c0_i32_0 : i32, i32
  }
  func.func @transform_4(%arg0: i32) -> (i32, i32) {
    %c0_i32 = arith.constant 0 : i32
    %c0_i32_0 = arith.constant 0 : i32
    %c0_i32_1 = arith.constant 0 : i32
    return %c0_i32, %c0_i32_0 : i32, i32
  }
  func.func @transform_5(%arg0: i32) -> (i32, i32) {
    %c0_i32 = arith.constant 0 : i32
    %c0_i32_0 = arith.constant 0 : i32
    return %arg0, %c0_i32 : i32, i32
  }
}

</mosaic_0001>

<bundles_post_ra>
// kernel: tpu_custom_call.1
= control target key start
LH: loop header
LB: loop body
LE: loop exit
PB: predicated region body
PF: predicated region fallthrough
CT: control target
= control target key end

     0   :  { %10 = vsyncpa [#allocation3], 0  ;;  %s558_s0 = inlined_call_operand.hbm [shape: bf16[8,128], index: 0, kind: input, shape index: {}]   ;;  %s559_s1 = inlined_call_operand.hbm [shape: bf16[128,128], index: 1, kind: input, shape index: {}]   ;;  %s560_s2 = inlined_call_operand.vmem [shape: f32[1,128], index: 2, kind: input, shape index: {}]   ;;  %s561_s3 = inlined_call_operand.hbm [shape: bf16[128,128], index: 3, kind: input, shape index: {}]   ;;  %s562_s4 = inlined_call_operand.vmem [shape: f32[1,128], index: 4, kind: input, shape index: {}]   ;;  %s563_s5 = inlined_call_operand.hbm [shape: f32[8,128], index: 5, kind: output, shape index: {}]  }
   0x1   :  { %11 = vsyncpa [#allocation6], 0 }
   0x2   :  { %12 = vsyncpa [#allocation4], 0  ;;  %s502_s18 = smov [#allocation5]  }
   0x3   :  { %s28_s19 = sshll.u32 %s502_s18, 4  ;;  %s29_s19 = int_to_ptr.vmem [resolvable:$true] %s28_s19 }
   0x4   :  { %s424_s20 = scalar_lea.vmem %s29_s19, 1024  ;;  %p429_p1 = scmp.lt.s32.totalorder %s29_s19, %s29_s19 }
   0x5   :  { %p425_p0 = scmp.ne.s32.totalorder %s29_s19, %s424_s20  ;;  %p430_p2 = scmp.lt.s32.totalorder %s424_s20, %s424_s20 }
   0x7   :  { %p431_p3 = por %p430_p2, %p429_p1 }
   0x9   :  { %p432_p4 = pnand %p431_p3, %p425_p0 }
   0xb   :  { %435 = shalt.err (!%p432_p4)
}
   0xc   :  { %s503_s21 = smov 64   ;;  %s504_s22 = smov 4  }
   0xd   :  { %34 = dma.hbm_to_vmem [thread:$0]  %s559_s1, 1024, %s29_s19, [#allocation6], %s503_s21, %s503_s21, %s504_s22  }
   0xe   :  { %s505_s25 = smov [#allocation2]   ;;  %s506_s27 = smov [#allocation7]  }
   0xf   :  { %s19_s26 = sshll.u32 %s505_s25, 4  ;;  %s42_s28 = sshll.u32 %s506_s27, 4  ;;  %s20_s26 = int_to_ptr.vmem [resolvable:$true] %s19_s26  ;;  %s43_s28 = int_to_ptr.vmem [resolvable:$true] %s42_s28 }
  0x10   :  { %s444_s29 = scalar_lea.vmem %s20_s26, 64  ;;  %p449_p6 = scmp.lt.s32.totalorder %s20_s26, %s20_s26 }
  0x11   :  { %p445_p5 = scmp.ne.s32.totalorder %s20_s26, %s444_s29  ;;  %p450_p7 = scmp.lt.s32.totalorder %s444_s29, %s444_s29 }
  0x13   :  { %p451_p8 = por %p450_p7, %p449_p6 }
  0x15   :  { %p452_p9 = pnand %p451_p8, %p445_p5 }
  0x17   :  { %455 = shalt.err (!%p452_p9)
}
  0x18   :  { %22 = dma.hbm_to_vmem [thread:$0]  %s558_s0, 64, %s20_s26, [#allocation3]  }
  0x19   :  { %s464_s7 = scalar_lea.vmem %s43_s28, 1024  ;;  %p469_p11 = scmp.lt.s32.totalorder %s43_s28, %s43_s28 }
  0x1a   :  { %p465_p10 = scmp.ne.s32.totalorder %s43_s28, %s464_s7  ;;  %p470_p12 = scmp.lt.s32.totalorder %s464_s7, %s464_s7 }
  0x1c   :  { %p471_p13 = por %p470_p12, %p469_p11 }
  0x1e   :  { %p472_p0 = pnand %p471_p13, %p465_p10 }
  0x20   :  { %475 = shalt.err (!%p472_p0)
}
  0x21   :  { %48 = dma.hbm_to_vmem [thread:$0]  %s561_s3, 1024, %s43_s28, [#allocation6], %s503_s21, %s503_s21, %s504_s22  }
  0x22   :  { %496 = dma.done.wait [#allocation3], 64  }
  0x23   :  { %497 = vsyncadd [#allocation3], 4294967232 }
  0x24   :  { %498 = dma.done.wait [#allocation6], 2048  }
  0x25   :  { %499 = vsyncadd [#allocation6], 4294965248  ;;  %v507_v0 = vmov 0.0   ;;  %vm508_vm0 = vmmov 0   ;;  %v396_v1 = vld [vmem:[#allocation5 + $0x38] sm:$0xff]   ;;  %v397_v2 = vld [vmem:[#allocation5 + $0x30] sm:$0xff]  }
  0x26   :  { %348 = vmatprep.subr.bf16.mxu0 %v507_v0  ;;  %364 = vmatprep.mubr.msk.bf16.mxu0 %vm508_vm0, %v507_v0  ;;  %v398_v3 = vld [vmem:[#allocation5 + $0x28] sm:$0xff]   ;;  %v404_v4 = vld [vmem:[#allocation7 + $0x38] sm:$0xff]   ;;  %v399_v5 = vld [vmem:[#allocation5 + $0x20] sm:$0xff]  }
  0x27   :  { %368 = vmatprep.subr.bf16.mxu1 %v507_v0  ;;  %384 = vmatprep.mubr.msk.bf16.mxu1 %vm508_vm0, %v507_v0  ;;  %v405_v6 = vld [vmem:[#allocation7 + $0x30] sm:$0xff]   ;;  %v400_v7 = vld [vmem:[#allocation5 + $0x18] sm:$0xff]   ;;  %v406_v8 = vld [vmem:[#allocation7 + $0x28] sm:$0xff]  }
  0x28   :  { %349 = vmatpush3.bf16.msra.mxu0 %v396_v1  ;;  %369 = vmatpush3.bf16.msra.mxu1 %v404_v4  ;;  %v401_v9 = vld [vmem:[#allocation5 + $0x10] sm:$0xff]   ;;  %v407_v10 = vld [vmem:[#allocation7 + $0x20] sm:$0xff]   ;;  %v402_v11 = vld [vmem:[#allocation5 + $0x8] sm:$0xff]  }
  0x29   :  { %350 = vmatprep.subr.bf16.mxu0 %v507_v0  ;;  %370 = vmatprep.subr.bf16.mxu1 %v507_v0  ;;  %v408_v12 = vld [vmem:[#allocation7 + $0x18] sm:$0xff]   ;;  %v403_v13 = vld [vmem:[#allocation5] sm:$0xff]   ;;  %v409_v14 = vld [vmem:[#allocation7 + $0x10] sm:$0xff]  }
  0x2a   :  { %v61_v15 = vld [vmem:[#allocation2] sm:$0xf]  ;;  %v410_v16 = vld [vmem:[#allocation7 + $0x8] sm:$0xff]   ;;  %v411_v17 = vld [vmem:[#allocation7] sm:$0xff]  }
  0x2b   :  { %v312_v18 = vld [vmem:[%s560_s2] ss:$0 sm:$0xff]  ;;  %s509_s2 = smov [#allocation8]  }
  0x2c   :  { %351 = vmatpush3.bf16.msra.mxu0 %v397_v2  ;;  %371 = vmatpush3.bf16.msra.mxu1 %v405_v6  ;;  %v321_v26 = vld [vmem:[%s562_s4] ss:$0 sm:$0xff]  ;;  %s302_s11 = sshll.u32 %s509_s2, 4  ;;  %s303_s11 = int_to_ptr.vmem [resolvable:$true] %s302_s11 }
  0x2d   :  { %352 = vmatprep.subr.bf16.mxu0 %v507_v0  ;;  %372 = vmatprep.subr.bf16.mxu1 %v507_v0  ;;  %s476_s4 = scalar_lea.vmem %s303_s11, 128  ;;  %p481_p2 = scmp.lt.s32.totalorder %s303_s11, %s303_s11 }
  0x2e   :  { %p477_p1 = scmp.ne.s32.totalorder %s303_s11, %s476_s4  ;;  %p482_p3 = scmp.lt.s32.totalorder %s476_s4, %s476_s4 }
  0x30   :  { %353 = vmatpush3.bf16.msra.mxu0 %v398_v3  ;;  %373 = vmatpush3.bf16.msra.mxu1 %v406_v8  ;;  %p483_p4 = por %p482_p3, %p481_p2 }
  0x31   :  { %354 = vmatprep.subr.bf16.mxu0 %v507_v0  ;;  %374 = vmatprep.subr.bf16.mxu1 %v507_v0 }
  0x32   :  { %p484_p5 = pnand %p483_p4, %p477_p1 }
  0x34   :  { %355 = vmatpush3.bf16.msra.mxu0 %v399_v5  ;;  %375 = vmatpush3.bf16.msra.mxu1 %v407_v10 }
  0x35   :  { %356 = vmatprep.subr.bf16.mxu0 %v507_v0  ;;  %376 = vmatprep.subr.bf16.mxu1 %v507_v0 }
  0x38   :  { %357 = vmatpush3.bf16.msra.mxu0 %v400_v7  ;;  %377 = vmatpush3.bf16.msra.mxu1 %v408_v12 }
  0x39   :  { %358 = vmatprep.subr.bf16.mxu0 %v507_v0  ;;  %378 = vmatprep.subr.bf16.mxu1 %v507_v0 }
  0x3c   :  { %359 = vmatpush3.bf16.msra.mxu0 %v401_v9  ;;  %379 = vmatpush3.bf16.msra.mxu1 %v409_v14 }
  0x3d   :  { %360 = vmatprep.subr.bf16.mxu0 %v507_v0  ;;  %380 = vmatprep.subr.bf16.mxu1 %v507_v0 }
  0x40   :  { %361 = vmatpush3.bf16.msra.mxu0 %v402_v11  ;;  %381 = vmatpush3.bf16.msra.mxu1 %v410_v16 }
  0x41   :  { %362 = vmatprep.subr.bf16.mxu0 %v507_v0  ;;  %382 = vmatprep.subr.bf16.mxu1 %v507_v0 }
  0x44   :  { %363 = vmatpush3.bf16.msra.mxu0 %v403_v13  ;;  %383 = vmatpush3.bf16.msra.mxu1 %v411_v17 }
  0x47   :  { %365 = vmatmul.mubr.bf16.vlgmr.msra.gmra.mxu0 %v61_v15 }
 0x107   :  { %v167_v19 = vpop.f32.mrf.mxu0 }
 0x108   :  { %v168_v20 = vadd.f32 %v312_v18, %v167_v19 }
 0x109   :  { %v366_v21 = vpop.f32.mrf.mxu0 }
 0x10a   :  { %v173_v22 = vmax.f32 %v168_v20, 0.0 }
 0x10b   :  { %v170_v23 = vpop.f32.mrf.mxu0 }
 0x10c   :  { %v174_v24 = vpack.c.bf16 %v173_v22, %v173_v22 }
 0x10d   :  { %v367_v25 = vpop.f32.mrf.mxu0 }
 0x10e   :  { %385 = vmatmul.mubr.bf16.vlgmr.msra.gmra.mxu1 %v174_v24 }
 0x1ce   :  { %v280_v27 = vpop.f32.mrf.mxu1 }
 0x1cf   :  { %v281_v28 = vadd.f32 %v321_v26, %v280_v27 }
 0x1d0   :  { %v386_v29 = vpop.f32.mrf.mxu1 }
 0x1d1   :  { %286 = vmax.xlane.f32.xlu0 %v281_v28 }
 0x1d2   :  { %v283_v30 = vpop.f32.mrf.mxu1 }
 0x1d4   :  { %v387_v31 = vpop.f32.mrf.mxu1 }
 0x25a   :  { %v287_v32 = vpop.xlane.xlu0 %286 }
 0x25b   :  { %v288_v33 = vsub.f32 %v281_v28, %v287_v32 }
 0x25d   :  { %v289_v34 = vmul.f32 1.442695, %v288_v33 }
 0x25f   :  { %412 = vpow2.f32 %v289_v34 }
 0x26c   :  { %v413_v35 = vpop.eup %412 }
 0x26d   :  { %291 = vadd.xlane.f32.xlu0 %v413_v35 }
 0x2f6   :  { %v292_v36 = vpop.xlane.xlu0 %291 }
 0x2f7   :  { %414 = vrcp.f32 %v292_v36 }
 0x304   :  { %v415_v37 = vpop.eup %414 }
 0x305   :  { %v294_v38 = vmul.f32 %v415_v37, %v413_v35 }
 0x307   :  { %295 = vst [vmem:[#allocation8] sm:$0xff] %v294_v38 }
 0x308   :  { %487 = shalt.err (!%p484_p5)
}
 0x309   :  { %305 = dma.vmem_to_hbm [thread:$0]  %s303_s11, 128, %s563_s5, [#allocation4]  }
 0x30a   :  { %500 = dma.done.wait [#allocation4], 128  }
 0x30b   :  { %501 = vsyncadd [#allocation4], 4294967168 }
 0x30c   :  { %309 = vsyncpa [#allocation3], 1 }
 0x30d   :  { %310 = vsyncpa [#allocation6], 1 }
 0x30e   :  { %311 = vsyncpa [#allocation4], 1 }

</bundles_post_ra>
